<compile_context>
chip_gen: v7x
topology: tpu7x:2x2x1
jax: 0.10.0
libtpu: 0.0.40
codegen_flags: <defaults>
</compile_context>

<pallas_src>
import jax
import jax.numpy as jnp
from jax.experimental import pallas as pl
from jax.experimental.pallas import tpu as pltpu

EPS = 1e-5


# ----------------------------- Pallas kernels ------------------------------ #

def conv1x1_bn_relu_kernel(x_ref, w_ref, scale_ref, shift_ref, o_ref):
    # x_ref: (1, H, W*Cin) packed image; w_ref: (W*Cin, W*Cout) block-diagonal
    # kron(I_W, W); scale/shift: (1, W*Cout) pre-tiled folded BN.
    y = jnp.dot(x_ref[0], w_ref[...], preferred_element_type=jnp.float32)
    y = jnp.maximum(y * scale_ref[...] + shift_ref[...], 0.0)
    o_ref[0] = y.astype(o_ref.dtype)


def conv3x3_bn_relu_kernel(x_ref, w_ref, sdn_ref, sup_ref, scale_ref, shift_ref,
                           o_ref):
    # x_ref:  (1, H, W*Cin) packed image.
    # w_ref:  (3, W*Cin, W*Cout) banded weights; w_ref[dy] holds the dx=0..2 taps
    #         folded into a block-tridiagonal matrix (zero pad encoded by the band).
    # sdn/sup: (H, H) sub/super-diagonal shift matrices (row h reads h-1 / h+1,
    #          zero rows encode the vertical zero padding).
    x = x_ref[0]                                                     # (H, W*Cin)
    acc = jnp.dot(x, w_ref[1], preferred_element_type=jnp.float32)   # dy tap: h
    x_dn = jnp.dot(sdn_ref[...], x, preferred_element_type=jnp.float32)  # rows h-1
    acc = acc + jnp.dot(x_dn, w_ref[0], preferred_element_type=jnp.float32)
    x_up = jnp.dot(sup_ref[...], x, preferred_element_type=jnp.float32)  # rows h+1
    acc = acc + jnp.dot(x_up, w_ref[2], preferred_element_type=jnp.float32)
    y = jnp.maximum(acc * scale_ref[...] + shift_ref[...], 0.0)
    o_ref[0] = y.astype(o_ref.dtype)


def _make_maxpool3x3_kernel(c):
    """3x3 / stride 1 / pad 1 max-pool on the packed (H, W*C) layout."""
    def kernel(x_ref, pleft_ref, pright_ref, sdn_ref, sup_ref, o_ref):
        x = x_ref[0]                                                 # (H, W*C)
        h, wc = x.shape
        neg = jnp.asarray(-jnp.inf, x.dtype)
        lane = jax.lax.broadcasted_iota(jnp.int32, (h, wc), 1)
        row = jax.lax.broadcasted_iota(jnp.int32, (h, wc), 0)
        # Horizontal (dx) taps: exact 0/1 lane-permutation matmuls; re-mask the
        # border columns to -inf (PyTorch MaxPool2d padding is ignored in the max).
        x_l = jnp.where(lane < c, neg,
                        jnp.dot(x, pleft_ref[...],
                                preferred_element_type=jnp.float32))
        x_r = jnp.where(lane >= wc - c, neg,
                        jnp.dot(x, pright_ref[...],
                                preferred_element_type=jnp.float32))
        m = jnp.maximum(x, jnp.maximum(x_l, x_r))                    # finite
        # Vertical (dy) taps: sub/super-diagonal row-shift matmuls + border masks.
        m_u = jnp.where(row == 0, neg,
                        jnp.dot(sdn_ref[...], m,
                                preferred_element_type=jnp.float32))
        m_d = jnp.where(row == h - 1, neg,
                        jnp.dot(sup_ref[...], m,
                                preferred_element_type=jnp.float32))
        o_ref[0] = jnp.maximum(m, jnp.maximum(m_u, m_d)).astype(o_ref.dtype)
    return kernel


def conv1x1_bias_kernel(x_ref, w_ref, bias_ref, o_ref):
    # Final plain Conv2d(outplanes, outplanes, 1) with bias; no BN / ReLU.
    y = jnp.dot(x_ref[0], w_ref[...], preferred_element_type=jnp.float32)
    o_ref[0] = (y + bias_ref[...]).astype(o_ref.dtype)


# ----------------------------- pallas_call glue ----------------------------- #

_PARALLEL = pltpu.CompilerParams(dimension_semantics=("parallel",))


def _conv1x1_bn_relu(xp, w, scale, shift):
    n, h, wcin = xp.shape
    wcout = w.shape[1]
    return pl.pallas_call(
        conv1x1_bn_relu_kernel,
        out_shape=jax.ShapeDtypeStruct((n, h, wcout), xp.dtype),
        grid=(n,),
        in_specs=[
            pl.BlockSpec((1, h, wcin), lambda i: (i, 0, 0)),
            pl.BlockSpec(w.shape, lambda i: (0, 0)),
            pl.BlockSpec(scale.shape, lambda i: (0, 0)),
            pl.BlockSpec(shift.shape, lambda i: (0, 0)),
        ],
        out_specs=pl.BlockSpec((1, h, wcout), lambda i: (i, 0, 0)),
        compiler_params=_PARALLEL,
    )(xp, w, scale, shift)


def _conv3x3_bn_relu(xp, w3, s_dn, s_up, scale, shift):
    n, h, wcin = xp.shape
    wcout = w3.shape[-1]
    return pl.pallas_call(
        conv3x3_bn_relu_kernel,
        out_shape=jax.ShapeDtypeStruct((n, h, wcout), xp.dtype),
        grid=(n,),
        in_specs=[
            pl.BlockSpec((1, h, wcin), lambda i: (i, 0, 0)),
            pl.BlockSpec(w3.shape, lambda i: (0, 0, 0)),
            pl.BlockSpec(s_dn.shape, lambda i: (0, 0)),
            pl.BlockSpec(s_up.shape, lambda i: (0, 0)),
            pl.BlockSpec(scale.shape, lambda i: (0, 0)),
            pl.BlockSpec(shift.shape, lambda i: (0, 0)),
        ],
        out_specs=pl.BlockSpec((1, h, wcout), lambda i: (i, 0, 0)),
        compiler_params=_PARALLEL,
    )(xp, w3, s_dn, s_up, scale, shift)


def _maxpool3x3(xp, c, p_left, p_right, s_dn, s_up):
    n, h, wc = xp.shape
    return pl.pallas_call(
        _make_maxpool3x3_kernel(c),
        out_shape=jax.ShapeDtypeStruct((n, h, wc), xp.dtype),
        grid=(n,),
        in_specs=[
            pl.BlockSpec((1, h, wc), lambda i: (i, 0, 0)),
            pl.BlockSpec(p_left.shape, lambda i: (0, 0)),
            pl.BlockSpec(p_right.shape, lambda i: (0, 0)),
            pl.BlockSpec(s_dn.shape, lambda i: (0, 0)),
            pl.BlockSpec(s_up.shape, lambda i: (0, 0)),
        ],
        out_specs=pl.BlockSpec((1, h, wc), lambda i: (i, 0, 0)),
        compiler_params=_PARALLEL,
    )(xp, p_left, p_right, s_dn, s_up)


def _conv1x1_bias(xp, w, bias):
    n, h, wcin = xp.shape
    wcout = w.shape[1]
    return pl.pallas_call(
        conv1x1_bias_kernel,
        out_shape=jax.ShapeDtypeStruct((n, h, wcout), xp.dtype),
        grid=(n,),
        in_specs=[
            pl.BlockSpec((1, h, wcin), lambda i: (i, 0, 0)),
            pl.BlockSpec(w.shape, lambda i: (0, 0)),
            pl.BlockSpec(bias.shape, lambda i: (0, 0)),
        ],
        out_specs=pl.BlockSpec((1, h, wcout), lambda i: (i, 0, 0)),
        compiler_params=_PARALLEL,
    )(xp, w, bias)


# ------------------------------- parameters -------------------------------- #

def _fold_bn(gamma, beta, mean, var):
    scale = gamma * jax.lax.rsqrt(var + EPS)
    shift = beta - mean * scale
    return scale, shift


def make_cell_params(key, inplanes, outplanes):
    """Deterministic synthetic raw parameters for all 13 candidate ops."""
    params = {"conv1x1": [], "conv3x3": []}
    for _ in range(4):
        key, k1, k2, k3, k4, k5 = jax.random.split(key, 6)
        w1 = jax.random.normal(k1, (inplanes, outplanes), jnp.float32) * 0.1
        g = jax.random.uniform(k2, (outplanes,), jnp.float32, 0.8, 1.2)
        b = jax.random.normal(k3, (outplanes,), jnp.float32) * 0.05
        m = jax.random.normal(k4, (outplanes,), jnp.float32) * 0.05
        v = jax.random.uniform(k5, (outplanes,), jnp.float32, 0.5, 1.5)
        params["conv1x1"].append((w1,) + _fold_bn(g, b, m, v))

        key, k1, k2, k3, k4, k5 = jax.random.split(key, 6)
        w3 = jax.random.normal(k1, (3, 3, inplanes, outplanes), jnp.float32) * 0.1
        g = jax.random.uniform(k2, (outplanes,), jnp.float32, 0.8, 1.2)
        b = jax.random.normal(k3, (outplanes,), jnp.float32) * 0.05
        m = jax.random.normal(k4, (outplanes,), jnp.float32) * 0.05
        v = jax.random.uniform(k5, (outplanes,), jnp.float32, 0.5, 1.5)
        params["conv3x3"].append((w3,) + _fold_bn(g, b, m, v))

    key, k1, k2 = jax.random.split(key, 3)
    params["proj"] = (
        jax.random.normal(k1, (outplanes, outplanes), jnp.float32) * 0.1,
        jax.random.normal(k2, (outplanes,), jnp.float32) * 0.05,
    )
    return params


def pack_cell_params(raw, height, width):
    """Host-side one-time repack into the lane-dense (W*C) operator forms."""
    def tile_vec(v):  # per-channel -> per-(w,c) lane
        return jnp.tile(v, width).reshape(1, -1)

    eye_w = jnp.eye(width, dtype=jnp.float32)
    packed = {"conv1x1": [], "conv3x3": []}

    for w1, sc, sh in raw["conv1x1"]:
        packed["conv1x1"].append((jnp.kron(eye_w, w1), tile_vec(sc), tile_vec(sh)))

    # sel[dx, w_in, w_out] = 1 iff w_in == w_out + dx - 1  (zero pad falls off band)
    sel = jnp.stack([jnp.eye(width, k=1 - dx, dtype=jnp.float32) for dx in range(3)])
    for w3, sc, sh in raw["conv3x3"]:
        cin, cout = w3.shape[2], w3.shape[3]
        band = jnp.einsum("dab,ydio->yaibo", sel, w3)
        band = band.reshape(3, width * cin, width * cout)
        packed["conv3x3"].append((band, tile_vec(sc), tile_vec(sh)))

    wp, bp = raw["proj"]
    packed["proj"] = (jnp.kron(eye_w, wp), tile_vec(bp))

    cin = raw["conv1x1"][0][0].shape[0]
    # Row-shift matrices (dy) and lane-permutation matrices (dx) for pooling.
    packed["s_dn"] = jnp.eye(height, k=-1, dtype=jnp.float32)   # row h reads h-1
    packed["s_up"] = jnp.eye(height, k=1, dtype=jnp.float32)    # row h reads h+1
    packed["p_left"] = jnp.kron(jnp.eye(width, k=1, dtype=jnp.float32),
                                jnp.eye(cin, dtype=jnp.float32))   # reads w-1
    packed["p_right"] = jnp.kron(jnp.eye(width, k=-1, dtype=jnp.float32),
                                 jnp.eye(cin, dtype=jnp.float32))  # reads w+1
    return packed


# --------------------------------- forward --------------------------------- #

def cell_forward(x_nchw, packed, op_index):
    """Cell.forward == OneShotPathOP forwarding the active candidate `op_index`.

    op_index in [0, 11]: group = op_index // 3, kind = op_index % 3
      kind 0 -> ConvBnRelu 1x1, kind 1 -> ConvBnRelu 3x3, kind 2 -> MaxPool 3x3.
    op_index == 12: plain 1x1 Conv2d(outplanes, outplanes) with bias.
    Input/output are NCHW (PyTorch convention).
    """
    n, c, h, w = x_nchw.shape
    # NCHW -> lane-dense packed layout (N, H, W*C); lane index = w*C + c.
    xp = jnp.transpose(x_nchw, (0, 2, 3, 1)).reshape(n, h, w * c)

    if op_index == 12:
        bw, bias = packed["proj"]
        y = _conv1x1_bias(xp, bw, bias)
        cout = bias.shape[-1] // w
    else:
        group, kind = divmod(op_index, 3)
        if kind == 0:
            bw, sc, sh = packed["conv1x1"][group]
            y = _conv1x1_bn_relu(xp, bw, sc, sh)
            cout = sc.shape[-1] // w
        elif kind == 1:
            b3, sc, sh = packed["conv3x3"][group]
            y = _conv3x3_bn_relu(xp, b3, packed["s_dn"], packed["s_up"], sc, sh)
            cout = sc.shape[-1] // w
        else:
            # TODO(synk): piconas MaxPool(inplanes, outplanes) is assumed to be a
            # pure 3x3/s1/p1 max-pool (no channel projection), as in NASBench-101.
            y = _maxpool3x3(xp, c, packed["p_left"], packed["p_right"],
                            packed["s_dn"], packed["s_up"])
            cout = c

    return jnp.transpose(y.reshape(n, h, w, cout), (0, 3, 1, 2))


# ---------------------------- pure-JAX reference ---------------------------- #

def reference_forward(x_nchw, raw, op_index):
    if op_index == 12:
        w, b = raw["proj"]
        return jnp.einsum("nchw,cd->ndhw", x_nchw, w) + b[None, :, None, None]
    group, kind = divmod(op_index, 3)
    if kind == 0:
        w, sc, sh = raw["conv1x1"][group]
        y = jnp.einsum("nchw,cd->ndhw", x_nchw, w)
        return jnp.maximum(y * sc[None, :, None, None] + sh[None, :, None, None], 0.0)
    if kind == 1:
        w, sc, sh = raw["conv3x3"][group]
        y = jax.lax.conv_general_dilated(
            x_nchw, w, window_strides=(1, 1), padding="SAME",
            dimension_numbers=("NCHW", "HWIO", "NCHW"))
        return jnp.maximum(y * sc[None, :, None, None] + sh[None, :, None, None], 0.0)
    return jax.lax.reduce_window(
        x_nchw, -jnp.inf, jax.lax.max,
        window_dimensions=(1, 1, 3, 3), window_strides=(1, 1, 1, 1),
        padding=((0, 0), (0, 0), (1, 1), (1, 1)))


# ----------------------------------- main ----------------------------------- #

if __name__ == "__main__":
    key = jax.random.PRNGKey(0)
    key, kx, kp = jax.random.split(key, 3)

    N, C, H, W = 2, 8, 16, 16          # inplanes == outplanes == 8; W*C == 128
    x = jax.random.normal(kx, (N, C, H, W), jnp.float32)
    raw = make_cell_params(kp, C, C)
    packed = pack_cell_params(raw, H, W)

    fwd = jax.jit(cell_forward, static_argnums=(2,))

    # Exercise each distinct candidate-op kernel once
    # (conv1x1+bn+relu, conv3x3+bn+relu, maxpool3x3, final plain conv1x1).
    for idx in (0, 1, 2, 12):
        out = jax.block_until_ready(fwd(x, packed, idx))
        assert out.shape == (N, C, H, W), (idx, out.shape)
        assert out.dtype == jnp.float32
        ref = reference_forward(x, raw, idx)
        err = float(jnp.max(jnp.abs(out - ref)))
        assert err < 3e-2, (idx, err)

    print("KERNEL_OK")
</pallas_src>

<mosaic_0001>
module attributes {stable_mosaic.version = 11 : i64} {
  func.func @conv1x1_bn_relu_kernel(%arg0: i32, %arg1: memref<1x16x128xf32, #tpu.memory_space<vmem>>, %arg2: memref<128x128xf32, #tpu.memory_space<vmem>>, %arg3: memref<1x128xf32, #tpu.memory_space<vmem>>, %arg4: memref<1x128xf32, #tpu.memory_space<vmem>>, %arg5: memref<1x16x128xf32, #tpu.memory_space<vmem>>) attributes {dimension_semantics = [#tpu.dimension_semantics<parallel>], iteration_bounds = array<i64: 2>, scalar_prefetch = 0 : i64, scratch_operands = 0 : i64, tpu.core_type = #tpu.core_type<tc>, window_params = [{transform_indices = @transform_0, window_bounds = array<i64: 1, 16, 128>}, {pipeline_mode = #tpu.pipeline_mode<synchronous>, transform_indices = @transform_1, window_bounds = array<i64: 128, 128>}, {pipeline_mode = #tpu.pipeline_mode<synchronous>, transform_indices = @transform_2, window_bounds = array<i64: 1, 128>}, {pipeline_mode = #tpu.pipeline_mode<synchronous>, transform_indices = @transform_3, window_bounds = array<i64: 1, 128>}, {transform_indices = @transform_4, window_bounds = array<i64: 1, 16, 128>}]} {
    %c0 = arith.constant 0 : index
    %c0_0 = arith.constant 0 : index
    %c0_1 = arith.constant 0 : index
    %0 = vector.load %arg1[%c0, %c0_0, %c0_1] : memref<1x16x128xf32, #tpu.memory_space<vmem>>, vector<1x16x128xf32>
    %1 = vector.shape_cast %0 : vector<1x16x128xf32> to vector<16x128xf32>
    %c0_2 = arith.constant 0 : index
    %c0_3 = arith.constant 0 : index
    %2 = vector.load %arg2[%c0_2, %c0_3] : memref<128x128xf32, #tpu.memory_space<vmem>>, vector<128x128xf32>
    %cst = arith.constant dense<0.000000e+00> : vector<16x128xf32>
    %3 = tpu.matmul %1, %2, %cst {dimension_numbers = #tpu.dot_dimension_numbers<[1], [0], [0], [1], [0, 0, 1, 1], [], []>} : vector<16x128xf32>, vector<128x128xf32>, vector<16x128xf32> -> vector<16x128xf32>
    %c0_4 = arith.constant 0 : index
    %c0_5 = arith.constant 0 : index
    %4 = vector.load %arg3[%c0_4, %c0_5] : memref<1x128xf32, #tpu.memory_space<vmem>>, vector<1x128xf32>
    %5 = vector.broadcast %4 : vector<1x128xf32> to vector<16x128xf32>
    %6 = arith.mulf %3, %5 : vector<16x128xf32>
    %c0_6 = arith.constant 0 : index
    %c0_7 = arith.constant 0 : index
    %7 = vector.load %arg4[%c0_6, %c0_7] : memref<1x128xf32, #tpu.memory_space<vmem>>, vector<1x128xf32>
    %8 = vector.broadcast %7 : vector<1x128xf32> to vector<16x128xf32>
    %9 = arith.addf %6, %8 : vector<16x128xf32>
    %cst_8 = arith.constant 0.000000e+00 : f32
    %10 = vector.broadcast %cst_8 : f32 to vector<16x128xf32>
    %11 = arith.maximumf %9, %10 : vector<16x128xf32>
    %c0_9 = arith.constant 0 : index
    %c0_10 = arith.constant 0 : index
    %c0_11 = arith.constant 0 : index
    %12 = vector.load %arg5[%c0_9, %c0_10, %c0_11] : memref<1x16x128xf32, #tpu.memory_space<vmem>>, vector<1x16x128xf32>
    %13 = vector.shape_cast %12 : vector<1x16x128xf32> to vector<16x128xf32>
    %14 = vector.shape_cast %11 : vector<16x128xf32> to vector<1x16x128xf32>
    tpu.vector_store %arg5[%c0_9, %c0_10, %c0_11], %14 {strides = array<i32>} : memref<1x16x128xf32, #tpu.memory_space<vmem>>, vector<1x16x128xf32>,
    return
  }
  func.func @transform_0(%arg0: i32) -> (i32, i32, i32) {
    %c0_i32 = arith.constant 0 : i32
    %c0_i32_0 = arith.constant 0 : i32
    %c0_i32_1 = arith.constant 0 : i32
    return %arg0, %c0_i32, %c0_i32_0 : i32, i32, i32
  }
  func.func @transform_1(%arg0: i32) -> (i32, i32) {
    %c0_i32 = arith.constant 0 : i32
    %c0_i32_0 = arith.constant 0 : i32
    %c0_i32_1 = arith.constant 0 : i32
    return %c0_i32, %c0_i32_0 : i32, i32
  }
  func.func @transform_2(%arg0: i32) -> (i32, i32) {
    %c0_i32 = arith.constant 0 : i32
    %c0_i32_0 = arith.constant 0 : i32
    %c0_i32_1 = arith.constant 0 : i32
    return %c0_i32, %c0_i32_0 : i32, i32
  }
  func.func @transform_3(%arg0: i32) -> (i32, i32) {
    %c0_i32 = arith.constant 0 : i32
    %c0_i32_0 = arith.constant 0 : i32
    %c0_i32_1 = arith.constant 0 : i32
    return %c0_i32, %c0_i32_0 : i32, i32
  }
  func.func @transform_4(%arg0: i32) -> (i32, i32, i32) {
    %c0_i32 = arith.constant 0 : i32
    %c0_i32_0 = arith.constant 0 : i32
    %c0_i32_1 = arith.constant 0 : i32
    return %arg0, %c0_i32, %c0_i32_0 : i32, i32, i32
  }
}

</mosaic_0001>

<bundles_post_ra>
// kernel: cell_forward.1
= control target key start
LH: loop header
LB: loop body
LE: loop exit
PB: predicated region body
PF: predicated region fallthrough
CT: control target
= control target key end

     0   :  { %s509_s15 = smov 0   ;;  %s591_s0 = inlined_call_operand.vmem [shape: f32[2,16,128], index: 0, kind: input, shape index: {}]   ;;  %s592_s1 = inlined_call_operand.vmem [shape: f32[128,128], index: 1, kind: input, shape index: {}]   ;;  %s593_s2 = inlined_call_operand.vmem [shape: f32[1,128], index: 2, kind: input, shape index: {}]   ;;  %s594_s3 = inlined_call_operand.vmem [shape: f32[1,128], index: 3, kind: input, shape index: {}]   ;;  %s595_s4 = inlined_call_operand.vmem [shape: f32[2,16,128], index: 4, kind: output, shape index: {}]  }
   0x1 LB: > { %s368_s16 = sadd.s32 4294967295, %s482_s15   ;;  %p372_p0 = scmp.ge.s32.totalorder %s482_s15, 1  ;;  %s482_s15 = sphi %s509_s15, %s14_s15  }
   0x2   : > { %p162_p1 = scmp.lt.s32.totalorder %s482_s15, 3 }
   0x4   : > { %p163_p2 = pnand %p372_p0, %p162_p1 }
   0x5   : > { %v200_v0 = vld [vmem:[%s592_s1] sm:$0xff] (!%p163_p2)  ;;  %v201_v1 = vld [vmem:[%s592_s1 + $0x8] sm:$0xff] (!%p163_p2)  ;;  %v202_v2 = vld [vmem:[%s592_s1 + $0x10] sm:$0xff] (!%p163_p2)  ;;  %p188_p3 = scmp.lt.s32.totalorder (!%p163_p2), %s368_s16, 1 }
   0x6   : > { %166 = sbr.rel (%p163_p2) target bundleno = 260 (0x104), region = 36  ;;  %v436_v3 = vpack.c.bf16 (!%p163_p2), %v201_v1, %v200_v0  ;;  %v203_v4 = vld [vmem:[%s592_s1 + $0x18] sm:$0xff] (!%p163_p2)  ;;  %v204_v6 = vld [vmem:[%s592_s1 + $0x20] sm:$0xff] (!%p163_p2)  ;;  %v205_v7 = vld [vmem:[%s592_s1 + $0x28] sm:$0xff] (!%p163_p2) }
   0x7   : > { %v440_v5 = vpack.c.bf16 (!%p163_p2), %v203_v4, %v202_v2  ;;  %v444_v8 = vpack.c.bf16 (!%p163_p2), %v205_v7, %v204_v6  ;;  %v206_v9 = vld [vmem:[%s592_s1 + $0x30] sm:$0xff] (!%p163_p2)  ;;  %v207_v10 = vld [vmem:[%s592_s1 + $0x38] sm:$0xff] (!%p163_p2)  ;;  %v208_v13 = vld [vmem:[%s592_s1 + $0x40] sm:$0xff] (!%p163_p2) }
   0x8   : > { %437 = vmatprep.subr.bf16.mxu0 (!%p163_p2), %v436_v3  ;;  %v448_v12 = vpack.c.bf16 (!%p163_p2), %v207_v10, %v206_v9  ;;  %v209_v14 = vld [vmem:[%s592_s1 + $0x48] sm:$0xff] (!%p163_p2)  ;;  %v210_v16 = vld [vmem:[%s592_s1 + $0x50] sm:$0xff] (!%p163_p2)  ;;  %v211_v17 = vld [vmem:[%s592_s1 + $0x58] sm:$0xff] (!%p163_p2) }
   0x9   : > { %439 = vmatpush3.bf16.msra.mxu0 (!%p163_p2), %v436_v3  ;;  %v452_v15 = vpack.c.bf16 (!%p163_p2), %v209_v14, %v208_v13  ;;  %v456_v18 = vpack.c.bf16 (!%p163_p2), %v211_v17, %v210_v16  ;;  %v212_v19 = vld [vmem:[%s592_s1 + $0x60] sm:$0xff] (!%p163_p2)  ;;  %v213_v20 = vld [vmem:[%s592_s1 + $0x68] sm:$0xff] (!%p163_p2)  ;;  %v214_v22 = vld [vmem:[%s592_s1 + $0x70] sm:$0xff] (!%p163_p2) }
   0xa   : > { %441 = vmatprep.subr.bf16.mxu0 (!%p163_p2), %v440_v5  ;;  %v460_v21 = vpack.c.bf16 (!%p163_p2), %v213_v20, %v212_v19  ;;  %v215_v23 = vld [vmem:[%s592_s1 + $0x78] sm:$0xff] (!%p163_p2)  ;;  %v377_v26 = vld [vmem:[%s593_s2] ss:$0 sm:$0xff] (!%p163_p2) }
   0xb   : > { %v464_v24 = vpack.c.bf16 (!%p163_p2), %v215_v23, %v214_v22  ;;  %v378_v28 = vld [vmem:[%s594_s3] ss:$0 sm:$0xff] (!%p163_p2) }
   0xd   : > { %s597_s16 = smov (!%p188_p3, %s368_s16), 1  ;;  %443 = vmatpush3.bf16.msra.mxu0 %v440_v5 }
   0xe   : > { %s381_s29 = sshll.u32 %s597_s16, 4  ;;  %445 = vmatprep.subr.bf16.mxu0 %v444_v8 }
   0xf   : > { %s543_s6 = scalar_lea.vmem %s591_s0, %s381_s29  ;;  %s197_s11 = scalar_lea.vmem %s595_s4, %s381_s29 }
  0x10   : > { %v198_v11 = vld [vmem:[%s543_s6] sm:$0xff]  ;;  %v199_v25 = vld [vmem:[%s543_s6 + $0x8] sm:$0xff] }
  0x11   : > { %433 = vmatprep.mubr.f32.mxu0 %v198_v11  ;;  %447 = vmatpush3.bf16.msra.mxu0 %v444_v8 }
  0x12   : > { %449 = vmatprep.subr.bf16.mxu0 %v448_v12 }
  0x15   : > { %451 = vmatpush3.bf16.msra.mxu0 %v448_v12 }
  0x16   : > { %453 = vmatprep.subr.bf16.mxu0 %v452_v15 }
  0x19   : > { %455 = vmatpush3.bf16.msra.mxu0 %v452_v15 }
  0x1a   : > { %457 = vmatprep.subr.bf16.mxu0 %v456_v18 }
  0x1d   : > { %459 = vmatpush3.bf16.msra.mxu0 %v456_v18 }
  0x1e   : > { %461 = vmatprep.subr.bf16.mxu0 %v460_v21 }
  0x21   : > { %463 = vmatpush3.bf16.msra.mxu0 %v460_v21 }
  0x22   : > { %465 = vmatprep.subr.bf16.mxu0 %v464_v24 }
  0x25   : > { %467 = vmatpush3.bf16.msra.mxu0 %v464_v24 }
  0x28   : > { %434 = vmatmul.mubr.f32.vlgmr.msra.gmra.mrb[0].mxu0 %v199_v25 }
  0xfb   : > { %v435_v27 = vpop.f32.mrb[0].mxu0 }
  0xfc   : > { %v299_v29 = vmul.f32 %v435_v27, %v377_v26  ;;  %v282_v30 = vpop.f32.mrb[1].mxu0 }
  0xfd   : > { %v298_v31 = vmul.f32 %v377_v26, %v282_v30 }
  0xfe   : > { %v308_v32 = vadd.f32 %v378_v28, %v299_v29 }
  0xff   : > { %v307_v33 = vadd.f32 %v378_v28, %v298_v31 }
 0x100   : > { %v310_v34 = vmax.f32 %v308_v32, 0.0 }
 0x101   : > { %v309_v35 = vmax.f32 %v307_v33, 0.0 }
 0x102   : > { %312 = vst [vmem:[%s197_s11 + $0x8] sm:$0xff] %v310_v34 }
 0x103   : > { %311 = vst [vmem:[%s197_s11] sm:$0xff] %v309_v35 }
 0x104 PF: > { %s14_s15 = sadd.s32 1, %s482_s15  }
 0x105   : > { %p11_p4 = scmp.ge.s32.totalorder %s14_s15, 4  }
 0x107   :  { %13 = sbr.rel (!%p11_p4) target bundleno = 1 (0x1), region = 66 }

</bundles_post_ra>
